<compile_context>
chip_gen: v6e
topology: v6e:2x2x1
jax: 0.10.0
libtpu: 0.0.40
codegen_flags: <defaults>
</compile_context>

<pallas_src>
import functools

import jax
import jax.numpy as jnp
from jax import lax
from jax.experimental import pallas as pl
from jax.experimental.pallas import tpu as pltpu


def _mlp_kernel(x_ref, w1_ref, b1_ref, w2_ref, b2_ref, oT_ref):
    # fc1, contracting over D_in without a materialized x.T:
    #   (H, D_in) . (tb, D_in) -> (H, tb)
    h = lax.dot_general(
        w1_ref[...], x_ref[...],
        dimension_numbers=(((1,), (1,)), ((), ())),
        preferred_element_type=jnp.float32,
        precision=lax.Precision.HIGHEST)
    h = jnp.maximum(h + b1_ref[...], 0.0)             # bias (H,1) broadcasts, ReLU
    # fc2: (O, H) @ (H, tb) -> (O, tb)  -> lane-dense store (batch on lanes)
    out = jnp.dot(w2_ref[...], h,
                  preferred_element_type=jnp.float32,
                  precision=lax.Precision.HIGHEST)
    oT_ref[...] = (out + b2_ref[...]).astype(oT_ref.dtype)


def _round_up(x, m):
    return -(-x // m) * m


@functools.partial(jax.jit, static_argnames=("tile_b",))
def grating_nn_forward(x, w1, b1, w2, b2, *, tile_b=8192):
    """Forward pass of GratingNN.

    x:  (B, D_in) float32
    w1: (H, D_in) float32, b1: (H,) float32     (PyTorch nn.Linear layout)
    w2: (O, H)    float32, b2: (O,) float32
    returns (B, O) float32
    """
    B, D_in = x.shape
    H = w1.shape[0]
    O = w2.shape[0]

    if B <= tile_b:
        # Single block covering the whole (possibly non-8/128-aligned) batch:
        # full-array block dims satisfy the (8,128) rule.
        tb = B
    else:
        # Multiple of 128 (lane-dense output), balanced toward >=2 even tiles
        # so a v7x megacore keeps both TensorCores busy.
        tb = min(tile_b, _round_up(pl.cdiv(B, 2), 128))
    grid_b = pl.cdiv(B, tb)                      # ragged last block handled by Pallas

    b1c = b1.reshape(H, 1)
    b2c = b2.reshape(O, 1)

    outT = pl.pallas_call(
        _mlp_kernel,
        out_shape=jax.ShapeDtypeStruct((O, B), jnp.float32),
        grid=(grid_b,),
        in_specs=[
            pl.BlockSpec((tb, D_in), lambda i: (i, 0)),   # x tile, natural layout (pipelined)
            pl.BlockSpec((H, D_in), lambda i: (0, 0)),    # w1 resident in VMEM
            pl.BlockSpec((H, 1), lambda i: (0, 0)),       # b1 resident
            pl.BlockSpec((O, H), lambda i: (0, 0)),       # w2 resident
            pl.BlockSpec((O, 1), lambda i: (0, 0)),       # b2 resident
        ],
        out_specs=pl.BlockSpec((O, tb), lambda i: (0, i)),  # lane-dense (batch on lanes)
        compiler_params=pltpu.CompilerParams(
            dimension_semantics=("parallel",),            # v7x megacore sharding
        ),
    )(x, w1, b1c, w2, b2c)

    return outT.T                                 # (B, O); tiny transpose (O is 2)


def init_params(key, input_size, hidden_size=128, out_size=2):
    """Deterministic init mirroring nn.Linear defaults (uniform +-1/sqrt(fan_in)),
    stored in PyTorch (out_features, in_features) layout."""
    k1, k2, k3, k4 = jax.random.split(key, 4)
    bound1 = 1.0 / jnp.sqrt(jnp.float32(input_size))
    bound2 = 1.0 / jnp.sqrt(jnp.float32(hidden_size))
    w1 = jax.random.uniform(k1, (hidden_size, input_size), jnp.float32, -bound1, bound1)
    b1 = jax.random.uniform(k2, (hidden_size,), jnp.float32, -bound1, bound1)
    w2 = jax.random.uniform(k3, (out_size, hidden_size), jnp.float32, -bound2, bound2)
    b2 = jax.random.uniform(k4, (out_size,), jnp.float32, -bound2, bound2)
    return w1, b1, w2, b2


def _reference(x, w1, b1, w2, b2):
    h = jnp.maximum(
        jnp.dot(x, w1.T, precision=lax.Precision.HIGHEST) + b1, 0.0)
    return jnp.dot(h, w2.T, precision=lax.Precision.HIGHEST) + b2


if __name__ == "__main__":
    key = jax.random.PRNGKey(0)
    kx, kx2, kp = jax.random.split(key, 3)

    input_size = 32
    hidden_size = 128

    w1, b1, w2, b2 = init_params(kp, input_size, hidden_size)

    # Small-batch path: single full-array block.
    x_small = jax.random.normal(kx, (8, input_size), jnp.float32)
    out_small = jax.block_until_ready(grating_nn_forward(x_small, w1, b1, w2, b2))
    ref_small = _reference(x_small, w1, b1, w2, b2)
    assert out_small.shape == (8, 2)
    assert jnp.allclose(out_small, ref_small, atol=1e-5, rtol=1e-5)

    # Tiled path: B=200, tile_b=128 -> grid=(2,), ragged last block, no padding.
    x_big = jax.random.normal(kx2, (200, input_size), jnp.float32)
    out_big = jax.block_until_ready(
        grating_nn_forward(x_big, w1, b1, w2, b2, tile_b=128))
    ref_big = _reference(x_big, w1, b1, w2, b2)
    assert out_big.shape == (200, 2)
    assert jnp.allclose(out_big, ref_big, atol=1e-5, rtol=1e-5)

    print("KERNEL_OK")
</pallas_src>

<mosaic_0001>
module attributes {stable_mosaic.version = 11 : i64} {
  func.func @_mlp_kernel(%arg0: i32, %arg1: memref<8x32xf32, #tpu.memory_space<vmem>>, %arg2: memref<128x32xf32, #tpu.memory_space<vmem>>, %arg3: memref<128x1xf32, #tpu.memory_space<vmem>>, %arg4: memref<2x128xf32, #tpu.memory_space<vmem>>, %arg5: memref<2x1xf32, #tpu.memory_space<vmem>>, %arg6: memref<2x8xf32, #tpu.memory_space<vmem>>) attributes {dimension_semantics = [#tpu.dimension_semantics<parallel>], iteration_bounds = array<i64: 1>, scalar_prefetch = 0 : i64, scratch_operands = 0 : i64, tpu.core_type = #tpu.core_type<tc>, window_params = [{transform_indices = @transform_0, window_bounds = array<i64: 8, 32>}, {pipeline_mode = #tpu.pipeline_mode<synchronous>, transform_indices = @transform_1, window_bounds = array<i64: 128, 32>}, {pipeline_mode = #tpu.pipeline_mode<synchronous>, transform_indices = @transform_2, window_bounds = array<i64: 128, 1>}, {pipeline_mode = #tpu.pipeline_mode<synchronous>, transform_indices = @transform_3, window_bounds = array<i64: 2, 128>}, {pipeline_mode = #tpu.pipeline_mode<synchronous>, transform_indices = @transform_4, window_bounds = array<i64: 2, 1>}, {transform_indices = @transform_5, window_bounds = array<i64: 2, 8>}]} {
    %c0 = arith.constant 0 : index
    %c0_0 = arith.constant 0 : index
    %0 = vector.load %arg2[%c0, %c0_0] : memref<128x32xf32, #tpu.memory_space<vmem>>, vector<128x32xf32>
    %c0_1 = arith.constant 0 : index
    %c0_2 = arith.constant 0 : index
    %1 = vector.load %arg1[%c0_1, %c0_2] : memref<8x32xf32, #tpu.memory_space<vmem>>, vector<8x32xf32>
    %cst = arith.constant dense<0.000000e+00> : vector<128x8xf32>
    %2 = tpu.matmul %0, %1, %cst {dimension_numbers = #tpu.dot_dimension_numbers<[1], [1], [0], [0], [0, 0, 1, 0], [], []>, precision = #tpu.contract_precision<fp32>} : vector<128x32xf32>, vector<8x32xf32>, vector<128x8xf32> -> vector<128x8xf32>
    %c0_3 = arith.constant 0 : index
    %c0_4 = arith.constant 0 : index
    %3 = vector.load %arg3[%c0_3, %c0_4] : memref<128x1xf32, #tpu.memory_space<vmem>>, vector<128x1xf32>
    %4 = vector.broadcast %3 : vector<128x1xf32> to vector<128x8xf32>
    %5 = arith.addf %2, %4 : vector<128x8xf32>
    %cst_5 = arith.constant 0.000000e+00 : f32
    %6 = vector.broadcast %cst_5 : f32 to vector<128x8xf32>
    %7 = arith.maximumf %5, %6 : vector<128x8xf32>
    %c0_6 = arith.constant 0 : index
    %c0_7 = arith.constant 0 : index
    %8 = vector.load %arg4[%c0_6, %c0_7] : memref<2x128xf32, #tpu.memory_space<vmem>>, vector<2x128xf32>
    %cst_8 = arith.constant dense<0.000000e+00> : vector<2x8xf32>
    %9 = tpu.matmul %8, %7, %cst_8 {dimension_numbers = #tpu.dot_dimension_numbers<[1], [0], [0], [1], [0, 0, 1, 1], [], []>, precision = #tpu.contract_precision<fp32>} : vector<2x128xf32>, vector<128x8xf32>, vector<2x8xf32> -> vector<2x8xf32>
    %c0_9 = arith.constant 0 : index
    %c0_10 = arith.constant 0 : index
    %10 = vector.load %arg5[%c0_9, %c0_10] : memref<2x1xf32, #tpu.memory_space<vmem>>, vector<2x1xf32>
    %11 = vector.broadcast %10 : vector<2x1xf32> to vector<2x8xf32>
    %12 = arith.addf %9, %11 : vector<2x8xf32>
    %c0_11 = arith.constant 0 : index
    %c0_12 = arith.constant 0 : index
    %13 = vector.load %arg6[%c0_11, %c0_12] : memref<2x8xf32, #tpu.memory_space<vmem>>, vector<2x8xf32>
    tpu.vector_store %arg6[%c0_11, %c0_12], %12 {strides = array<i32>} : memref<2x8xf32, #tpu.memory_space<vmem>>, vector<2x8xf32>,
    return
  }
  func.func @transform_0(%arg0: i32) -> (i32, i32) {
    %c0_i32 = arith.constant 0 : i32
    %c0_i32_0 = arith.constant 0 : i32
    return %arg0, %c0_i32 : i32, i32
  }
  func.func @transform_1(%arg0: i32) -> (i32, i32) {
    %c0_i32 = arith.constant 0 : i32
    %c0_i32_0 = arith.constant 0 : i32
    %c0_i32_1 = arith.constant 0 : i32
    return %c0_i32, %c0_i32_0 : i32, i32
  }
  func.func @transform_2(%arg0: i32) -> (i32, i32) {
    %c0_i32 = arith.constant 0 : i32
    %c0_i32_0 = arith.constant 0 : i32
    %c0_i32_1 = arith.constant 0 : i32
    return %c0_i32, %c0_i32_0 : i32, i32
  }
  func.func @transform_3(%arg0: i32) -> (i32, i32) {
    %c0_i32 = arith.constant 0 : i32
    %c0_i32_0 = arith.constant 0 : i32
    %c0_i32_1 = arith.constant 0 : i32
    return %c0_i32, %c0_i32_0 : i32, i32
  }
  func.func @transform_4(%arg0: i32) -> (i32, i32) {
    %c0_i32 = arith.constant 0 : i32
    %c0_i32_0 = arith.constant 0 : i32
    %c0_i32_1 = arith.constant 0 : i32
    return %c0_i32, %c0_i32_0 : i32, i32
  }
  func.func @transform_5(%arg0: i32) -> (i32, i32) {
    %c0_i32 = arith.constant 0 : i32
    %c0_i32_0 = arith.constant 0 : i32
    return %c0_i32, %arg0 : i32, i32
  }
}

</mosaic_0001>

<bundles_post_ra>
// kernel: grating_nn_forward.1
= control target key start
LH: loop header
LB: loop body
LE: loop exit
PB: predicated region body
PF: predicated region fallthrough
CT: control target
= control target key end

     0   :  { %vm134_vm0 = vcmask 261120   ;;  %v2555_v9 = vmov 0   ;;  %s3475_s0 = inlined_call_operand.vmem [shape: f32[8,32], index: 0, kind: input, shape index: {}]   ;;  %s3476_s1 = inlined_call_operand.vmem [shape: f32[128,32], index: 1, kind: input, shape index: {}]   ;;  %s3477_s2 = inlined_call_operand.vmem [shape: f32[128,1], index: 2, kind: input, shape index: {}]   ;;  %s3478_s3 = inlined_call_operand.vmem [shape: f32[2,128], index: 3, kind: input, shape index: {}]   ;;  %s3479_s4 = inlined_call_operand.vmem [shape: f32[2,1], index: 4, kind: input, shape index: {}]   ;;  %s3480_s5 = inlined_call_operand.hbm [shape: f32[2,8], index: 5, kind: output, shape index: {}]  }
   0x1   :  { %v37_v0 = vld [vmem:[%s3475_s0] sm:$0xff]  ;;  %v22_v2 = vld [vmem:[%s3476_s1 + $0x8] sm:$0xff]  ;;  %v23_v6 = vld [vmem:[%s3476_s1 + $0x10] sm:$0xff]  ;;  %2532 = vset.pattern.permute.xlu1 %v2555_v9  ;;  %2531 = vset.pattern.permute.xlu0 %v2555_v9 }
   0x2   :  { %v21_v1 = vld [vmem:[%s3476_s1] sm:$0xff]  ;;  %v184_v3 = vsel %vm134_vm0, %v37_v0, 0  ;;  %v139_v5 = vsel %vm134_vm0, %v22_v2, 0  ;;  %v24_v7 = vld [vmem:[%s3476_s1 + $0x18] sm:$0xff]  ;;  %v142_v13 = vsel %vm134_vm0, %v23_v6, 0  ;;  %v26_v14 = vld [vmem:[%s3476_s1 + $0x28] sm:$0xff] }
   0x3   :  { %v136_v4 = vsel %vm134_vm0, %v21_v1, 0  ;;  %v25_v8 = vld [vmem:[%s3476_s1 + $0x20] sm:$0xff]  ;;  %v2610_v10 = vand.u32 4294901760, %v184_v3  ;;  %v2614_v12 = vand.u32 4294901760, %v139_v5  ;;  %v27_v15 = vld [vmem:[%s3476_s1 + $0x30] sm:$0xff]  ;;  %v2623_v16 = vand.u32 4294901760, %v142_v13 }
   0x4   :  { %v2612_v11 = vand.u32 4294901760, %v136_v4  ;;  %v145_v17 = vsel %vm134_vm0, %v24_v7, 0  ;;  %v148_v18 = vsel %vm134_vm0, %v25_v8, 0  ;;  %v151_v19 = vsel %vm134_vm0, %v26_v14, 0  ;;  %v53_v32 = vld [vmem:[%s3477_s2 + $0x78] sm:$0xff]  ;;  %v51_v33 = vld [vmem:[%s3477_s2 + $0x68] sm:$0xff] }
   0x5   :  { %2161 = vmatprep.subr.mxu0 %v2610_v10  ;;  %v444_v21 = vsub.f32 %v184_v3, %v2610_v10  ;;  %v2634_v22 = vsub.f32 %v139_v5, %v2614_v12  ;;  %v2637_v23 = vand.u32 4294901760, %v145_v17  ;;  %v2641_v24 = vsub.f32 %v142_v13, %v2623_v16  ;;  %131 = vperm.xlu0 %2531, %v53_v32   ;;  %v52_v42 = vld [vmem:[%s3477_s2 + $0x70] sm:$0xff]  ;;  %v50_v43 = vld [vmem:[%s3477_s2 + $0x60] sm:$0xff]  ;;  %v28_v48 = vld [vmem:[%s3476_s1 + $0x38] sm:$0xff] }
   0x6   :  { %v2630_v20 = vsub.f32 %v136_v4, %v2612_v11  ;;  %2189 = vmatprep.mubr.f32.mxu1 %v2612_v11  ;;  %2162 = vmatpush3.xpose.msra.mxu0 %v2610_v10  ;;  %v2643_v25 = vand.u32 4294901760, %v148_v18  ;;  %v2645_v26 = vand.u32 4294901760, %v151_v19  ;;  %v154_v27 = vsel %vm134_vm0, %v27_v15, 0  ;;  %v29_v49 = vld [vmem:[%s3476_s1 + $0x40] sm:$0xff]  ;;  %v30_v50 = vld [vmem:[%s3476_s1 + $0x48] sm:$0xff]  ;;  %v31_v59 = vld [vmem:[%s3476_s1 + $0x50] sm:$0xff] }
   0x7   :  { %v2649_v29 = vand.u32 4294901760, %v444_v21  ;;  %v264_v30 = vand.u32 4294901760, %v2634_v22  ;;  %2213 = vmatprep.subr.mxu0 %v444_v21  ;;  %v2653_v31 = vsub.f32 %v145_v17, %v2637_v23  ;;  %v274_v34 = vand.u32 4294901760, %v2641_v24  ;;  %121 = vperm.xlu1 %2532, %v51_v33   ;;  %v32_v60 = vld [vmem:[%s3476_s1 + $0x58] sm:$0xff] }
   0x8   :  { %v254_v28 = vand.u32 4294901760, %v2630_v20  ;;  %v2663_v35 = vsub.f32 %v148_v18, %v2643_v25  ;;  %v2666_v36 = vsub.f32 %v151_v19, %v2645_v26  ;;  %v2668_v37 = vand.u32 4294901760, %v154_v27 }
   0x9   :  { %v446_v39 = vsub.f32 %v444_v21, %v2649_v29  ;;  %v265_v40 = vsub.f32 %v2634_v22, %v264_v30  ;;  %v284_v41 = vand.u32 4294901760, %v2653_v31  ;;  %v275_v44 = vsub.f32 %v2641_v24, %v274_v34  ;;  %126 = vperm.xlu0 %2531, %v52_v42  }
   0xa   :  { %v255_v38 = vsub.f32 %v2630_v20, %v254_v28  ;;  %v294_v45 = vand.u32 4294901760, %v2663_v35  ;;  %v304_v46 = vand.u32 4294901760, %v2666_v36  ;;  %v2690_v47 = vsub.f32 %v154_v27, %v2668_v37 }
   0xb   :  { %v447_v52 = vand.u32 4294901760, %v446_v39  ;;  %v266_v53 = vand.u32 4294901760, %v265_v40  ;;  %v285_v54 = vsub.f32 %v2653_v31, %v284_v41  ;;  %v276_v55 = vand.u32 4294901760, %v275_v44  ;;  %116 = vperm.xlu1 %2532, %v50_v43  }
   0xc   :  { %v256_v51 = vand.u32 4294901760, %v255_v38  ;;  %v295_v56 = vsub.f32 %v2663_v35, %v294_v45  ;;  %v2710_v57 = vsub.f32 %v2666_v36, %v304_v46  ;;  %v314_v58 = vand.u32 4294901760, %v2690_v47 }
   0xd   :  { %2187 = vmatprep.subr.mxu1 %v447_v52  ;;  %v286_v61 = vand.u32 4294901760, %v285_v54  ;;  %v157_v62 = vsel %vm134_vm0, %v28_v48, 0  ;;  %v160_v63 = vsel %vm134_vm0, %v29_v49, 0  ;;  %v163_v0 = vsel %vm134_vm0, %v30_v50, 0 }
   0xe   :  { %2163 = vmatprep.mubr.f32.mxu0 %v256_v51 }
   0xf   :  { %10 = vsyncpa [#allocation3], 0  ;;  %2164 = vmatmul.mubr.f32.vlgmr.msra.gmra.mxu0 %v266_v53  ;;  %2188 = vmatpush3.xpose.msra.mxu1 %v447_v52  ;;  %v296_v1 = vand.u32 4294901760, %v295_v56  ;;  %v306_v2 = vand.u32 4294901760, %v2710_v57  ;;  %v315_v3 = vsub.f32 %v2690_v47, %v314_v58  ;;  %v2726_v4 = vand.u32 4294901760, %v157_v62  ;;  %v33_v5 = vld [vmem:[%s3476_s1 + $0x60] sm:$0xff] }
  0x10   :  { %v34_v6 = vld [vmem:[%s3476_s1 + $0x68] sm:$0xff]  ;;  %v49_v7 = vld [vmem:[%s3477_s2 + $0x58] sm:$0xff]  ;;  %2214 = vmatpush3.xpose.msra.mxu0 %v444_v21  ;;  %2166 = vmatprep.mubr.f32.mxu0 %v276_v55  ;;  %v2737_v8 = vand.u32 4294901760, %v160_v63  ;;  %v2739_v9 = vand.u32 4294901760, %v163_v0  ;;  %v166_v13 = vsel %vm134_vm0, %v31_v59, 0  ;;  %v169_v14 = vsel %vm134_vm0, %v32_v60, 0 }
  0x11   :  { %2239 = vmatprep.subr.mxu1 %v2610_v10  ;;  %v316_v15 = vand.u32 4294901760, %v315_v3  ;;  %v2745_v17 = vsub.f32 %v157_v62, %v2726_v4  ;;  %v2747_v18 = vand.u32 4294901760, %v166_v13  ;;  %v2749_v19 = vand.u32 4294901760, %v169_v14  ;;  %v35_v21 = vld [vmem:[%s3476_s1 + $0x70] sm:$0xff]  ;;  %2265 = vmatprep.subr.mxu0 %v2649_v29  ;;  %v47_v48 = vld [vmem:[%s3477_s2 + $0x48] sm:$0xff]  ;;  %v36_v59 = vld [vmem:[%s3476_s1 + $0x78] sm:$0xff] }
  0x12   :  { %2190 = vmatmul.mubr.f32.vlgmr.msra.gmra.mxu1 %v2614_v12  ;;  %v2757_v27 = vsub.f32 %v160_v63, %v2737_v8  ;;  %v2760_v32 = vsub.f32 %v163_v0, %v2739_v9  ;;  %v172_v33 = vsel %vm134_vm0, %v33_v5, 0  ;;  %v175_v38 = vsel %vm134_vm0, %v34_v6, 0  ;;  %111 = vperm.xlu0 %2531, %v49_v7   ;;  %v48_v39 = vld [vmem:[%s3477_s2 + $0x50] sm:$0xff]  ;;  %v46_v60 = vld [vmem:[%s3477_s2 + $0x40] sm:$0xff] }
  0x13   :  { %2167 = vmatmul.mubr.f32.gmra.mxu0 %v286_v61  ;;  %2240 = vmatpush3.xpose.msra.mxu1 %v2610_v10  ;;  %v324_v40 = vand.u32 4294901760, %v2745_v17  ;;  %v2770_v42 = vsub.f32 %v166_v13, %v2747_v18  ;;  %v2773_v43 = vsub.f32 %v169_v14, %v2749_v19  ;;  %v2775_v44 = vand.u32 4294901760, %v172_v33  ;;  %v44_v14 = vld [vmem:[%s3477_s2 + $0x30] sm:$0xff] }
  0x14   :  { %2192 = vmatprep.mubr.f32.mxu1 %v2623_v16  ;;  %2169 = vmatprep.mubr.f32.mxu0 %v296_v1  ;;  %v334_v49 = vand.u32 4294901760, %v2757_v27  ;;  %v344_v50 = vand.u32 4294901760, %v2760_v32  ;;  %v2783_v51 = vand.u32 4294901760, %v175_v38  ;;  %v178_v52 = vsel %vm134_vm0, %v35_v21, 0  ;;  %v45_v1 = vld [vmem:[%s3477_s2 + $0x38] sm:$0xff] }
  0x15   :  { %v325_v53 = vsub.f32 %v2745_v17, %v324_v40  ;;  %v354_v54 = vand.u32 4294901760, %v2770_v42  ;;  %v2791_v55 = vsub.f32 %v172_v33, %v2775_v44  ;;  %2291 = vmatprep.subr.mxu1 %v2610_v10  ;;  %106 = vperm.xlu1 %2532, %v48_v39   ;;  %v2798_v57 = vand.u32 4294901760, %v178_v52 }
  0x16   :  { %2193 = vmatmul.mubr.f32.gmra.mxu1 %v2637_v23  ;;  %v335_v56 = vsub.f32 %v2757_v27, %v334_v49  ;;  %101 = vperm.xlu0 %2531, %v47_v48   ;;  %v345_v62 = vsub.f32 %v2760_v32, %v344_v50  ;;  %v364_v63 = vand.u32 4294901760, %v2773_v43  ;;  %v2812_v0 = vsub.f32 %v175_v38, %v2783_v51  ;;  %v43_v38 = vld [vmem:[%s3477_s2 + $0x28] sm:$0xff] }
  0x17   :  { %2170 = vmatmul.mubr.f32.gmra.mxu0 %v306_v2  ;;  %2195 = vmatprep.mubr.f32.mxu1 %v2643_v25  ;;  %v326_v61 = vand.u32 4294901760, %v325_v53  ;;  %v355_v2 = vsub.f32 %v2770_v42, %v354_v54  ;;  %v374_v5 = vand.u32 4294901760, %v2791_v55  ;;  %v2822_v6 = vsub.f32 %v178_v52, %v2798_v57 }
  0x18   :  { %2172 = vmatprep.mubr.f32.mxu0 %v316_v15  ;;  %v336_v3 = vand.u32 4294901760, %v335_v56  ;;  %v181_v7 = vsel %vm134_vm0, %v36_v59, 0  ;;  %v346_v15 = vand.u32 4294901760, %v345_v62  ;;  %v365_v21 = vsub.f32 %v2773_v43, %v364_v63  ;;  %v42_v56 = vld [vmem:[%s3477_s2 + $0x20] sm:$0xff]  ;;  %v41_v62 = vld [vmem:[%s3477_s2 + $0x18] sm:$0xff] }
  0x19   :  { %96 = vperm.xlu1 %2532, %v46_v60   ;;  %v2826_v13 = vand.u32 4294901760, %v181_v7  ;;  %v384_v33 = vand.u32 4294901760, %v2812_v0  ;;  %v356_v39 = vand.u32 4294901760, %v355_v2  ;;  %v375_v48 = vsub.f32 %v2791_v55, %v374_v5  ;;  %v40_v2 = vld [vmem:[%s3477_s2 + $0x10] sm:$0xff] }
  0x1a   :  { %2196 = vmatmul.mubr.f32.gmra.mxu1 %v2645_v26  ;;  %91 = vperm.xlu0 %2531, %v45_v1   ;;  %v394_v52 = vand.u32 4294901760, %v2822_v6  ;;  %v366_v59 = vand.u32 4294901760, %v365_v21  ;;  %vm2557_vm1 = vmmov 0   ;;  %vm1941_vm2 = vcmask 58368  }
  0x1b   :  { %2173 = vmatmul.mubr.f32.gmra.mxu0 %v326_v61  ;;  %2198 = vmatprep.mubr.f32.mxu1 %v2668_v37  ;;  %v2844_v53 = vsub.f32 %v181_v7, %v2826_v13  ;;  %v385_v60 = vsub.f32 %v2812_v0, %v384_v33  ;;  %v376_v1 = vand.u32 4294901760, %v375_v48  ;;  %v1294_v48 = vld [vmem:[%s3479_s4] sm:$0x3] }
  0x1c   :  { %2175 = vmatprep.mubr.f32.mxu0 %v336_v3  ;;  %v395_v3 = vsub.f32 %v2822_v6, %v394_v52 }
  0x1d   :  { %86 = vperm.xlu1 %2532, %v44_v14   ;;  %v404_v61 = vand.u32 4294901760, %v2844_v53  ;;  %v386_v7 = vand.u32 4294901760, %v385_v60 }
  0x1e   :  { %2199 = vmatmul.mubr.f32.gmra.mxu1 %v2726_v4  ;;  %81 = vperm.xlu0 %2531, %v43_v38   ;;  %v396_v21 = vand.u32 4294901760, %v395_v3  ;;  %v38_v38 = vld [vmem:[%s3477_s2] sm:$0xff] }
  0x1f   :  { %2176 = vmatmul.mubr.f32.gmra.mxu0 %v346_v15  ;;  %2201 = vmatprep.mubr.f32.mxu1 %v2737_v8  ;;  %v405_v14 = vsub.f32 %v2844_v53, %v404_v61  ;;  %v39_v15 = vld [vmem:[%s3477_s2 + $0x8] sm:$0xff] }
  0x20   :  { %2178 = vmatprep.mubr.f32.mxu0 %v356_v39 }
  0x21   :  { %76 = vperm.xlu1 %2532, %v42_v56   ;;  %v406_v39 = vand.u32 4294901760, %v405_v14 }
  0x22   :  { %2202 = vmatmul.mubr.f32.gmra.mxu1 %v2739_v9  ;;  %71 = vperm.xlu0 %2531, %v41_v62  }
  0x23   :  { %2179 = vmatmul.mubr.f32.gmra.mxu0 %v366_v59  ;;  %2204 = vmatprep.mubr.f32.mxu1 %v2747_v18 }
  0x24   :  { %2181 = vmatprep.mubr.f32.mxu0 %v376_v1 }
  0x25   :  { %66 = vperm.xlu1 %2532, %v40_v2  }
  0x26   :  { %2205 = vmatmul.mubr.f32.gmra.mxu1 %v2749_v19  ;;  %61 = vperm.xlu0 %2531, %v39_v15  }
  0x27   :  { %2182 = vmatmul.mubr.f32.gmra.mxu0 %v386_v7  ;;  %2207 = vmatprep.mubr.f32.mxu1 %v2775_v44 }
  0x28   :  { %2184 = vmatprep.mubr.f32.mxu0 %v396_v21 }
  0x29   :  { %56 = vperm.xlu1 %2532, %v38_v38  }
  0x2a   :  { %2208 = vmatmul.mubr.f32.gmra.mxu1 %v2783_v51  ;;  %1297 = vperm.xlu0 %2531, %v1294_v48  }
  0x2b   :  { %2185 = vmatmul.mubr.f32.gmra.mxu0 %v406_v39  ;;  %2210 = vmatprep.mubr.f32.mxu1 %v2798_v57 }
  0x2c   :  { %2215 = vmatprep.mubr.f32.mxu0 %v2630_v20 }
  0x2e   :  { %2211 = vmatmul.mubr.f32.gmra.mxu1 %v2826_v13 }
  0x2f   :  { %2216 = vmatmul.mubr.f32.vlgmr.msra.gmra.mxu0 %v2634_v22  ;;  %2241 = vmatprep.mubr.f32.mxu1 %v254_v28 }
  0x30   :  { %2266 = vmatpush3.xpose.msra.mxu0 %v2649_v29  ;;  %2218 = vmatprep.mubr.f32.mxu0 %v2641_v24  ;;  %v3481_v24 = vmov 0.0  }
  0x31   :  { %2317 = vmatprep.subr.mxu0 %v3481_v24 }
  0x32   :  { %2242 = vmatmul.mubr.f32.vlgmr.msra.gmra.mxu1 %v264_v30 }
  0x33   :  { %2219 = vmatmul.mubr.f32.gmra.mxu0 %v2653_v31  ;;  %2292 = vmatpush3.xpose.msra.mxu1 %v2610_v10 }
  0x34   :  { %2244 = vmatprep.mubr.f32.mxu1 %v274_v34  ;;  %2221 = vmatprep.mubr.f32.mxu0 %v2663_v35 }
  0x35   :  { %2352 = vmatprep.subr.mxu1 %v3481_v24 }
  0x36   :  { %2245 = vmatmul.mubr.f32.gmra.mxu1 %v284_v41 }
  0x37   :  { %2222 = vmatmul.mubr.f32.gmra.mxu0 %v2666_v36  ;;  %2247 = vmatprep.mubr.f32.mxu1 %v294_v45 }
  0x38   :  { %2224 = vmatprep.mubr.f32.mxu0 %v2690_v47 }
  0x3a   :  { %2248 = vmatmul.mubr.f32.gmra.mxu1 %v304_v46 }
  0x3b   :  { %2225 = vmatmul.mubr.f32.gmra.mxu0 %v2745_v17  ;;  %2250 = vmatprep.mubr.f32.mxu1 %v314_v58 }
  0x3c   :  { %2227 = vmatprep.mubr.f32.mxu0 %v2757_v27 }
  0x3e   :  { %2251 = vmatmul.mubr.f32.gmra.mxu1 %v324_v40 }
  0x3f   :  { %2228 = vmatmul.mubr.f32.gmra.mxu0 %v2760_v32  ;;  %2253 = vmatprep.mubr.f32.mxu1 %v334_v49 }
  0x40   :  { %2230 = vmatprep.mubr.f32.mxu0 %v2770_v42 }
  0x42   :  { %2254 = vmatmul.mubr.f32.gmra.mxu1 %v344_v50 }
  0x43   :  { %2231 = vmatmul.mubr.f32.gmra.mxu0 %v2773_v43  ;;  %2256 = vmatprep.mubr.f32.mxu1 %v354_v54 }
  0x44   :  { %2233 = vmatprep.mubr.f32.mxu0 %v2791_v55 }
  0x46   :  { %2257 = vmatmul.mubr.f32.gmra.mxu1 %v364_v63 }
  0x47   :  { %2234 = vmatmul.mubr.f32.gmra.mxu0 %v2812_v0  ;;  %2259 = vmatprep.mubr.f32.mxu1 %v374_v5 }
  0x48   :  { %2236 = vmatprep.mubr.f32.mxu0 %v2822_v6 }
  0x4a   :  { %2260 = vmatmul.mubr.f32.gmra.mxu1 %v384_v33 }
  0x4b   :  { %2237 = vmatmul.mubr.f32.gmra.mxu0 %v2844_v53  ;;  %2262 = vmatprep.mubr.f32.mxu1 %v394_v52 }
  0x4c   :  { %2267 = vmatprep.mubr.f32.mxu0 %v2612_v11 }
  0x4e   :  { %2263 = vmatmul.mubr.f32.gmra.mxu1 %v404_v61 }
  0x4f   :  { %2268 = vmatmul.mubr.f32.vlgmr.msra.gmra.mxu0 %v2614_v12  ;;  %2293 = vmatprep.mubr.f32.mxu1 %v2612_v11 }
  0x50   :  { %2270 = vmatprep.mubr.f32.mxu0 %v2623_v16 }
  0x52   :  { %2294 = vmatmul.mubr.f32.vlgmr.msra.gmra.mxu1 %v2614_v12 }
  0x53   :  { %2271 = vmatmul.mubr.f32.gmra.mxu0 %v2637_v23  ;;  %2296 = vmatprep.mubr.f32.mxu1 %v2623_v16 }
  0x54   :  { %2273 = vmatprep.mubr.f32.mxu0 %v2643_v25 }
  0x56   :  { %2297 = vmatmul.mubr.f32.gmra.mxu1 %v2637_v23 }
  0x57   :  { %2274 = vmatmul.mubr.f32.gmra.mxu0 %v2645_v26  ;;  %2299 = vmatprep.mubr.f32.mxu1 %v2643_v25 }
  0x58   :  { %2276 = vmatprep.mubr.f32.mxu0 %v2668_v37 }
  0x5a   :  { %2300 = vmatmul.mubr.f32.gmra.mxu1 %v2645_v26 }
  0x5b   :  { %2277 = vmatmul.mubr.f32.gmra.mxu0 %v2726_v4  ;;  %2302 = vmatprep.mubr.f32.mxu1 %v2668_v37 }
  0x5c   :  { %2279 = vmatprep.mubr.f32.mxu0 %v2737_v8 }
  0x5e   :  { %2303 = vmatmul.mubr.f32.gmra.mxu1 %v2726_v4 }
  0x5f   :  { %2280 = vmatmul.mubr.f32.gmra.mxu0 %v2739_v9  ;;  %2305 = vmatprep.mubr.f32.mxu1 %v2737_v8 }
  0x60   :  { %2282 = vmatprep.mubr.f32.mxu0 %v2747_v18 }
  0x62   :  { %2306 = vmatmul.mubr.f32.gmra.mxu1 %v2739_v9 }
  0x63   :  { %2283 = vmatmul.mubr.f32.gmra.mxu0 %v2749_v19  ;;  %2308 = vmatprep.mubr.f32.mxu1 %v2747_v18 }
  0x64   :  { %2285 = vmatprep.mubr.f32.mxu0 %v2775_v44 }
  0x66   :  { %2309 = vmatmul.mubr.f32.gmra.mxu1 %v2749_v19 }
  0x67   :  { %2286 = vmatmul.mubr.f32.gmra.mxu0 %v2783_v51  ;;  %2311 = vmatprep.mubr.f32.mxu1 %v2775_v44 }
  0x68   :  { %2288 = vmatprep.mubr.f32.mxu0 %v2798_v57 }
  0x6a   :  { %2312 = vmatmul.mubr.f32.gmra.mxu1 %v2783_v51 }
  0x6b   :  { %2289 = vmatmul.mubr.f32.gmra.mxu0 %v2826_v13  ;;  %2314 = vmatprep.mubr.f32.mxu1 %v2798_v57 }
  0x6c   :  { %2349 = vmatprep.mubr.msk.f32.mxu0 %vm2557_vm1, %v3481_v24 }
  0x6e   :  { %2315 = vmatmul.mubr.f32.gmra.mxu1 %v2826_v13 }
  0x6f   :  { %2384 = vmatprep.mubr.msk.f32.mxu1 %vm2557_vm1, %v3481_v24 }
  0x80   :  { %v2965_v10 = vpop.permute.xlu0 %131 }
  0x82   :  { %v2967_v11 = vpop.permute.xlu1 %121 }
  0x84   :  { %v2969_v12 = vpop.permute.xlu0 %126 }
  0x86   :  { %v2971_v16 = vpop.permute.xlu1 %116 }
  0x8d   :  { %v112_v20 = vpop.permute.xlu0 %111 }
  0x90   :  { %v107_v22 = vpop.permute.xlu1 %106 }
  0x91   :  { %v102_v23 = vpop.permute.xlu0 %101 }
  0x94   :  { %v97_v25 = vpop.permute.xlu1 %96 }
  0x95   :  { %v92_v26 = vpop.permute.xlu0 %91 }
  0x98   :  { %v87_v28 = vpop.permute.xlu1 %86 }
  0x99   :  { %v82_v29 = vpop.permute.xlu0 %81 }
  0x9c   :  { %v77_v30 = vpop.permute.xlu1 %76 }
  0x9d   :  { %v72_v31 = vpop.permute.xlu0 %71 }
  0xa0   :  { %v67_v34 = vpop.permute.xlu1 %66 }
  0xa1   :  { %v62_v35 = vpop.permute.xlu0 %61 }
  0xa4   :  { %v57_v37 = vpop.permute.xlu1 %56 }
  0xcf   :  { %v2165_v36 = vpop.f32.mrf.mxu0 }
  0xd0   :  { %v269_v41 = vadd.f32 %v2165_v36, %v62_v35 }
  0xd1   :  { %v258_v45 = vpop.f32.mrf.mxu0 }
  0xd2   :  { %v259_v46 = vadd.f32 %v258_v45, %v57_v37  ;;  %v2191_v47 = vpop.f32.mrf.mxu1 }
  0xd3   :  { %v491_v58 = vadd.f32 %v2191_v47, %v269_v41  ;;  %v2168_v4 = vpop.f32.mrf.mxu0 }
  0xd4   :  { %v289_v8 = vadd.f32 %v2168_v4, %v72_v31  ;;  %v484_v9 = vpop.f32.mrf.mxu1 }
  0xd5   :  { %v485_v17 = vadd.f32 %v484_v9, %v259_v46  ;;  %v278_v18 = vpop.f32.mrf.mxu0 }
  0xd6   :  { %v279_v19 = vadd.f32 %v278_v18, %v67_v34  ;;  %v2194_v27 = vpop.f32.mrf.mxu1 }
  0xd7   :  { %v503_v32 = vadd.f32 %v2194_v27, %v289_v8  ;;  %v2171_v40 = vpop.f32.mrf.mxu0 }
  0xd8   :  { %v309_v42 = vadd.f32 %v2171_v40, %v82_v29  ;;  %v496_v43 = vpop.f32.mrf.mxu1 }
  0xd9   :  { %v497_v44 = vadd.f32 %v496_v43, %v279_v19  ;;  %v298_v49 = vpop.f32.mrf.mxu0 }
  0xda   :  { %v299_v50 = vadd.f32 %v298_v49, %v77_v30  ;;  %v2197_v51 = vpop.f32.mrf.mxu1 }
  0xdb   :  { %v515_v54 = vadd.f32 %v2197_v51, %v309_v42  ;;  %v2174_v55 = vpop.f32.mrf.mxu0 }
  0xdc   :  { %v329_v57 = vadd.f32 %v2174_v55, %v92_v26  ;;  %v508_v63 = vpop.f32.mrf.mxu1 }
  0xdd   :  { %v509_v0 = vadd.f32 %v508_v63, %v299_v50  ;;  %v318_v5 = vpop.f32.mrf.mxu0 }
  0xde   :  { %v319_v6 = vadd.f32 %v318_v5, %v87_v28  ;;  %v2200_v13 = vpop.f32.mrf.mxu1 }
  0xdf   :  { %v2979_v33 = vadd.f32 %v2200_v13, %v329_v57  ;;  %v2177_v52 = vpop.f32.mrf.mxu0 }
  0xe0   :  { %v349_v53 = vadd.f32 %v2177_v52, %v102_v23  ;;  %v520_v56 = vpop.f32.mrf.mxu1 }
  0xe1   :  { %v2981_v59 = vadd.f32 %v520_v56, %v319_v6  ;;  %v338_v60 = vpop.f32.mrf.mxu0 }
  0xe2   :  { %v339_v61 = vadd.f32 %v338_v60, %v97_v25  ;;  %v2203_v62 = vpop.f32.mrf.mxu1 }
  0xe3   :  { %v2983_v1 = vadd.f32 %v2203_v62, %v349_v53  ;;  %v2180_v3 = vpop.f32.mrf.mxu0 }
  0xe4   :  { %v369_v2 = vadd.f32 %v2180_v3, %v112_v20  ;;  %v532_v7 = vpop.f32.mrf.mxu1 }
  0xe5   :  { %v2985_v14 = vadd.f32 %v532_v7, %v339_v61  ;;  %v358_v15 = vpop.f32.mrf.mxu0 }
  0xe6   :  { %v359_v21 = vadd.f32 %v358_v15, %v107_v22  ;;  %v2206_v38 = vpop.f32.mrf.mxu1 }
  0xe7   :  { %v2987_v39 = vadd.f32 %v2206_v38, %v369_v2  ;;  %v2183_v48 = vpop.f32.mrf.mxu0 }
  0xe8   :  { %v389_v23 = vadd.f32 %v2183_v48, %v2967_v11  ;;  %v544_v26 = vpop.f32.mrf.mxu1 }
  0xe9   :  { %v2990_v28 = vadd.f32 %v544_v26, %v359_v21  ;;  %v378_v25 = vpop.f32.mrf.mxu0 }
  0xea   :  { %v379_v29 = vadd.f32 %v378_v25, %v2971_v16  ;;  %v2209_v30 = vpop.f32.mrf.mxu1 }
  0xeb   :  { %v2993_v31 = vadd.f32 %v2209_v30, %v389_v23  ;;  %v2995_v20 = vpop.f32.mrf.mxu0 }
  0xec   :  { %v556_v34 = vpop.f32.mrf.mxu1 }
  0xed   :  { %v2997_v35 = vadd.f32 %v556_v34, %v379_v29  ;;  %v2999_v22 = vpop.f32.mrf.mxu0 }
  0xee   :  { %v3001_v36 = vpop.f32.mrf.mxu1 }
  0xef   :  { %v2217_v37 = vpop.f32.mrf.mxu0 }
  0xf0   :  { %v656_v11 = vadd.f32 %v2217_v37, %v491_v58  ;;  %v3003_v41 = vpop.f32.mrf.mxu1 }
  0xf1   :  { %v648_v45 = vpop.f32.mrf.mxu0 }
  0xf2   :  { %v649_v46 = vadd.f32 %v648_v45, %v485_v17  ;;  %v2243_v47 = vpop.f32.mrf.mxu1 }
  0xf3   :  { %v3005_v16 = vadd.f32 %v2243_v47, %v656_v11  ;;  %v2220_v4 = vpop.f32.mrf.mxu0 }
  0xf4   :  { %v670_v8 = vadd.f32 %v2220_v4, %v503_v32  ;;  %v827_v9 = vpop.f32.mrf.mxu1 }
  0xf5   :  { %v3007_v18 = vadd.f32 %v827_v9, %v649_v46  ;;  %v662_v19 = vpop.f32.mrf.mxu0 }
  0xf6   :  { %v663_v27 = vadd.f32 %v662_v19, %v497_v44  ;;  %v2246_v40 = vpop.f32.mrf.mxu1 }
  0xf7   :  { %3483 = vst [vmem:[#allocation5_spill] sm:$0xff] %v3007_v18  ;;  %v3009_v42 = vadd.f32 %v2246_v40, %v670_v8  ;;  %v2223_v43 = vpop.f32.mrf.mxu0 }
  0xf8   :  { %v684_v49 = vadd.f32 %v2223_v43, %v515_v54  ;;  %v843_v58 = vpop.f32.mrf.mxu1  ;;  %v409_v43 = vadd.f32 %v2995_v20, %v2965_v10 }
  0xf9   :  { %v3011_v50 = vadd.f32 %v843_v58, %v663_v27  ;;  %v676_v51 = vpop.f32.mrf.mxu0 }
  0xfa   :  { %v677_v17 = vadd.f32 %v676_v51, %v509_v0  ;;  %v2249_v55 = vpop.f32.mrf.mxu1 }
  0xfb   :  { %v3013_v57 = vadd.f32 %v2249_v55, %v684_v49  ;;  %v2226_v63 = vpop.f32.mrf.mxu0 }
  0xfc   :  { %v859_v32 = vpop.f32.mrf.mxu1 }
  0xfd   :  { %v3015_v5 = vadd.f32 %v859_v32, %v677_v17  ;;  %v3017_v6 = vpop.f32.mrf.mxu0  ;;  %v399_v17 = vadd.f32 %v2999_v22, %v2969_v12 }
  0xfe   :  { %v3019_v44 = vpop.f32.mrf.mxu1 }
  0xff   :  { %v2229_v13 = vpop.f32.mrf.mxu0 }
 0x100   :  { %v3021_v52 = vpop.f32.mrf.mxu1 }
 0x101   :  { %v704_v54 = vpop.f32.mrf.mxu0 }
 0x102   :  { %v2255_v53 = vpop.f32.mrf.mxu1 }
 0x103   :  { %v2232_v56 = vpop.f32.mrf.mxu0 }
 0x104   :  { %v891_v60 = vpop.f32.mrf.mxu1  ;;  %v726_v58 = vadd.f32 %v2232_v56, %v2987_v39  ;;  %v569_v39 = vadd.f32 %v3003_v41, %v399_v17  ;;  %v705_v56 = vadd.f32 %v704_v54, %v2985_v14 }
 0x105   :  { %v718_v61 = vpop.f32.mrf.mxu0 }
 0x106   :  { %v2258_v0 = vpop.f32.mrf.mxu1  ;;  %v719_v24 = vadd.f32 %v718_v61, %v2990_v28 }
 0x107   :  { %v2235_v62 = vpop.f32.mrf.mxu0 }
 0x108   :  { %v907_v3 = vpop.f32.mrf.mxu1  ;;  %v740_v55 = vadd.f32 %v2235_v62, %v2993_v31  ;;  %v698_v62 = vadd.f32 %v2226_v63, %v2979_v33 }
 0x109   :  { %v732_v2 = vpop.f32.mrf.mxu0  ;;  %v908_v28 = vadd.f32 %v907_v3, %v719_v24 }
 0x10a   :  { %v2261_v7 = vpop.f32.mrf.mxu1  ;;  %v733_v10 = vadd.f32 %v732_v2, %v2997_v35  ;;  %v884_v63 = vadd.f32 %v3019_v44, %v698_v62 }
 0x10b   :  { %v2238_v15 = vpop.f32.mrf.mxu0  ;;  %v932_v12 = vadd.f32 %v2261_v7, %v740_v55 }
 0x10c   :  { %v923_v21 = vpop.f32.mrf.mxu1 }
 0x10d   :  { %v746_v38 = vpop.f32.mrf.mxu0 }
 0x10e   :  { %v2264_v48 = vpop.f32.mrf.mxu1 }
 0x10f   :  { %v3023_v23 = vpop.f32.mrf.mxu0 }
 0x110   :  { %v939_v26 = vpop.f32.mrf.mxu1 }
 0x111   :  { %v3025_v25 = vpop.f32.mrf.mxu0 }
 0x112   :  { %3484 = vst [vmem:[#allocation6_spill] sm:$0xff] %v3025_v25  ;;  %v3027_v29 = vpop.f32.mrf.mxu1  ;;  %v916_v25 = vadd.f32 %v2258_v0, %v726_v58  ;;  %v691_v0 = vadd.f32 %v3017_v6, %v2981_v59  ;;  %v892_v58 = vadd.f32 %v891_v60, %v705_v56 }
 0x113   :  { %3485 = vst [vmem:[#allocation7_spill] sm:$0xff] %v3027_v29  ;;  %v3029_v30 = vpop.f32.mrf.mxu0  ;;  %v575_v29 = vadd.f32 %v3001_v36, %v409_v43  ;;  %v924_v43 = vadd.f32 %v923_v21, %v733_v10 }
 0x114   :  { %v3031_v34 = vpop.f32.mrf.mxu1 }
 0x115   :  { %3486 = vst [vmem:[#allocation8_spill] sm:$0xff] %v3031_v34  ;;  %v3033_v37 = vpop.f32.mrf.mxu0  ;;  %v754_v22 = vadd.f32 %v2238_v15, %v575_v29 }
 0x116   :  { %v3035_v11 = vpop.f32.mrf.mxu1 }
 0x117   :  { %3487 = vst [vmem:[#allocation9_spill] sm:$0xff] %v3035_v11  ;;  %v3037_v45 = vpop.f32.mrf.mxu0  ;;  %v948_v14 = vadd.f32 %v2264_v48, %v754_v22 }
 0x118   :  { %v3039_v46 = vpop.f32.mrf.mxu1 }
 0x119   :  { %3488 = vst [vmem:[#allocation10_spill] sm:$0xff] %v3039_v46  ;;  %v3041_v47 = vpop.f32.mrf.mxu0  ;;  %v712_v46 = vadd.f32 %v2229_v13, %v2983_v1  ;;  %v747_v1 = vadd.f32 %v746_v38, %v569_v39 }
 0x11a   :  { %v3043_v4 = vpop.f32.mrf.mxu1 }
 0x11b   :  { %v2278_v8 = vpop.f32.mrf.mxu0  ;;  %v900_v36 = vadd.f32 %v2255_v53, %v712_v46  ;;  %v940_v53 = vadd.f32 %v939_v26, %v747_v1 }
 0x11c   :  { %v3045_v9 = vpop.f32.mrf.mxu1  ;;  %v1064_v6 = vadd.f32 %v2278_v8, %v884_v63 }
 0x11d   :  { %v1057_v19 = vpop.f32.mrf.mxu0 }
 0x11e   :  { %v3047_v27 = vpop.f32.mrf.mxu1 }
 0x11f   :  { %v2281_v40 = vpop.f32.mrf.mxu0  ;;  %v3075_v8 = vadd.f32 %v3047_v27, %v1064_v6 }
 0x120   :  { %v3051_v49 = vpop.f32.mrf.mxu1  ;;  %v1076_v54 = vadd.f32 %v2281_v40, %v900_v36 }
 0x121   :  { %v1069_v51 = vpop.f32.mrf.mxu0 }
 0x122   :  { %v2307_v32 = vpop.f32.mrf.mxu1  ;;  %v1070_v3 = vadd.f32 %v1069_v51, %v892_v58 }
 0x123   :  { %v2284_v34 = vpop.f32.mrf.mxu0  ;;  %v1238_v60 = vadd.f32 %v2307_v32, %v1076_v54 }
 0x124   :  { %v1231_v20 = vpop.f32.mrf.mxu1  ;;  %v1088_v61 = vadd.f32 %v2284_v34, %v916_v25 }
 0x125   :  { %v1081_v18 = vpop.f32.mrf.mxu0  ;;  %v1232_v26 = vadd.f32 %v1231_v20, %v1070_v3  ;;  %v1286_v32 = vmax.f32 %v1238_v60, 0.0  ;;  %v3491_v3 = vld [vmem:[#allocation5_spill] sm:$0xff] }
 0x126   :  { %v2310_v31 = vpop.f32.mrf.mxu1  ;;  %v1082_v2 = vadd.f32 %v1081_v18, %v908_v28  ;;  %v876_v18 = vadd.f32 %v3021_v52, %v691_v0  ;;  %v1052_v52 = vadd.f32 %v3037_v45, %v3013_v57  ;;  %v1028_v28 = vadd.f32 %v3023_v23, %v3005_v16 }
 0x127   :  { %v2287_v11 = vpop.f32.mrf.mxu0  ;;  %v1250_v29 = vadd.f32 %v2310_v31, %v1088_v61  ;;  %v1046_v61 = vadd.f32 %v3041_v47, %v3015_v5  ;;  %v1285_v45 = vmax.f32 %v1232_v26, 0.0  ;;  %v1040_v16 = vadd.f32 %v3029_v30, %v3009_v42 }
 0x128   :  { %v1100_v13 = vadd.f32 %v2287_v11, %v932_v12  ;;  %v1243_v35 = vpop.f32.mrf.mxu1  ;;  %v1058_v44 = vadd.f32 %v1057_v19, %v876_v18  ;;  %v3105_v5 = vadd.f32 %v3043_v4, %v1052_v52  ;;  %v1284_v23 = vmax.f32 %v3075_v8, 0.0 }
 0x129   :  { %v1093_v41 = vpop.f32.mrf.mxu0  ;;  %v1244_v25 = vadd.f32 %v1243_v35, %v1082_v2  ;;  %v1288_v40 = vmax.f32 %v1250_v29, 0.0  ;;  %v3108_v47 = vand.u32 4294901760, %v1286_v32  ;;  %v1034_v42 = vadd.f32 %v3033_v37, %v3011_v50  ;;  %v3490_v37 = vld [vmem:[#allocation9_spill] sm:$0xff] }
 0x12a   :  { %v1094_v7 = vadd.f32 %v1093_v41, %v924_v43  ;;  %v2313_v15 = vpop.f32.mrf.mxu1  ;;  %v3089_v57 = vadd.f32 %v3051_v49, %v1058_v44  ;;  %v3489_v49 = vmov 0.0   ;;  %v3123_v30 = vadd.f32 %v3045_v9, %v1046_v61 }
 0x12b   :  { %v1262_v33 = vadd.f32 %v2313_v15, %v1100_v13  ;;  %v2290_v24 = vpop.f32.mrf.mxu0  ;;  %v1287_v39 = vmax.f32 %v1244_v25, 0.0  ;;  %v3077_v31 = vand.u32 4294901760, %v1288_v40  ;;  %v3126_v41 = vand.u32 4294901760, %v1285_v45  ;;  %v3493_v25 = vld [vmem:[#allocation10_spill] sm:$0xff] }
 0x12c   :  { %v1112_v21 = vadd.f32 %v2290_v24, %v948_v14  ;;  %v1255_v38 = vpop.f32.mrf.mxu1  ;;  %v1283_v4 = vmax.f32 %v3089_v57, 0.0  ;;  %v3139_v9 = vadd.f32 %v3490_v37, %v1040_v16  ;;  %v3142_v15 = vand.u32 4294901760, %v1284_v23 }
 0x12d   :  { %v1290_v34 = vmax.f32 %v1262_v33, 0.0  ;;  %v1256_v11 = vadd.f32 %v1255_v38, %v1094_v7  ;;  %v1105_v59 = vpop.f32.mrf.mxu0  ;;  %v3091_v27 = vand.u32 4294901760, %v1287_v39  ;;  %v3112_v13 = vsub.f32 %v1288_v40, %v3077_v31  ;;  %v3494_v40 = vld [vmem:[#allocation7_spill] sm:$0xff] }
 0x12e   :  { %v1106_v48 = vadd.f32 %v1105_v59, %v940_v53  ;;  %v2316_v46 = vpop.f32.mrf.mxu1  ;;  %v1282_v7 = vmax.f32 %v3105_v5, 0.0  ;;  %v3145_v29 = vsub.f32 %v1286_v32, %v3108_v47  ;;  %v3162_v59 = vand.u32 4294901760, %v1283_v4 }
 0x12f   :  { %v3068_v17 = vand.u32 4294901760, %v1290_v34  ;;  %v1289_v55 = vmax.f32 %v1256_v11, 0.0  ;;  %v1274_v10 = vadd.f32 %v2316_v46, %v1112_v21  ;;  %v3130_v58 = vsub.f32 %v1287_v39, %v3091_v27  ;;  %v3492_v21 = vld [vmem:[#allocation6_spill] sm:$0xff]  ;;  %v1293_v46 = vld [vmem:[%s3478_s3] sm:$0x3]  ;;  %s2558_s3 = smov [#allocation2]  }
 0x130   :  { %v1267_v51 = vpop.f32.mrf.mxu1  ;;  %v1422_v33 = vand.u32 4294901760, %v3112_v13  ;;  %v1022_v38 = vadd.f32 %v3492_v21, %v3491_v3  ;;  %v1281_v11 = vmax.f32 %v3123_v30, 0.0  ;;  %v3166_v18 = vsub.f32 %v1285_v45, %v3126_v41  ;;  %s1949_s7 = sshll.u32 %s2558_s3, 4  ;;  %s1950_s7 = int_to_ptr.vmem [resolvable:$true] %s1949_s7 }
 0x131   :  { %v3070_v56 = vand.u32 4294901760, %v1289_v55  ;;  %v1292_v12 = vmax.f32 %v1274_v10, 0.0  ;;  %v1268_v22 = vadd.f32 %v1267_v51, %v1106_v48  ;;  %v3080_v62 = vsub.f32 %v1290_v34, %v3068_v17  ;;  %s2533_s8 = scalar_lea.vmem %s1950_s7, 32  ;;  %p2538_p1 = scmp.lt.s32.totalorder %s1950_s7, %s1950_s7 }
 0x132   :  { %v3159_v34 = vadd.f32 %v3493_v25, %v1034_v42  ;;  %v1429_v6 = vand.u32 4294901760, %v3130_v58  ;;  %v1280_v10 = vmax.f32 %v3139_v9, 0.0  ;;  %v3180_v44 = vand.u32 4294901760, %v1282_v7  ;;  %p2534_p0 = scmp.ne.s32.totalorder %s1950_s7, %s2533_s8  ;;  %p2539_p2 = scmp.lt.s32.totalorder %s2533_s8, %s2533_s8 }
 0x133   :  { %v3082_v19 = vand.u32 4294901760, %v1292_v12  ;;  %v1291_v20 = vmax.f32 %v1268_v22, 0.0  ;;  %v3094_v36 = vsub.f32 %v1289_v55, %v3070_v56  ;;  %v1408_v35 = vand.u32 4294901760, %v3080_v62  ;;  %v3495_v22 = vld [vmem:[#allocation8_spill] sm:$0xff] }
 0x134   :  { %v3177_v55 = vadd.f32 %v3494_v40, %v1028_v28  ;;  %v3185_v26 = vsub.f32 %v1284_v23, %v3142_v15  ;;  %v1436_v51 = vand.u32 4294901760, %v3145_v29  ;;  %v1423_v39 = vsub.f32 %v3112_v13, %v1422_v33  ;;  %p2540_p3 = por %p2539_p2, %p2538_p1 }
 0x135   :  { %v3097_v43 = vsub.f32 %v1292_v12, %v3082_v19  ;;  %v3099_v1 = vand.u32 4294901760, %v1291_v20  ;;  %2318 = vmatpush3.msra.mxu0 %v3082_v19  ;;  %v1415_v14 = vand.u32 4294901760, %v3094_v36  ;;  %v1409_v24 = vsub.f32 %v3080_v62, %v1408_v35 }
 0x136   :  { %2319 = vmatprep.subr.mxu0 %v3489_v49  ;;  %v3193_v52 = vadd.f32 %v3495_v22, %v1022_v38  ;;  %v1279_v8 = vmax.f32 %v3159_v34, 0.0  ;;  %v3196_v32 = vand.u32 4294901760, %v1281_v11  ;;  %v3203_v28 = vsub.f32 %v1283_v4, %v3162_v59  ;;  %p2541_p4 = pnand %p2540_p3, %p2534_p0 }
 0x137   :  { %v1394_v0 = vand.u32 4294901760, %v3097_v43  ;;  %v3117_v2 = vsub.f32 %v1291_v20, %v3099_v1  ;;  %2320 = vmatpush3.msra.mxu0 %v3099_v1  ;;  %v1416_v60 = vsub.f32 %v3094_v36, %v1415_v14  ;;  %v1410_v12 = vand.u32 4294901760, %v1409_v24 }
 0x138   :  { %2321 = vmatprep.subr.mxu0 %v3489_v49  ;;  %v3200_v20 = vand.u32 4294901760, %v1293_v46  ;;  %v1443_v61 = vand.u32 4294901760, %v3166_v18  ;;  %v1430_v57 = vsub.f32 %v3130_v58, %v1429_v6  ;;  %v1278_v16 = vmax.f32 %v3177_v55, 0.0 }
 0x139   :  { %v1395_v54 = vsub.f32 %v3097_v43, %v1394_v0  ;;  %v1401_v50 = vand.u32 4294901760, %v3117_v2  ;;  %2322 = vmatpush3.msra.mxu0 %v3068_v17  ;;  %v1417_v45 = vand.u32 4294901760, %v1416_v60  ;;  %v3211_v5 = vand.u32 4294901760, %v1280_v10 }
 0x13a   :  { %2323 = vmatprep.subr.mxu0 %v3489_v49  ;;  %v3216_v23 = vsub.f32 %v1282_v7, %v3180_v44  ;;  %v1450_v42 = vand.u32 4294901760, %v3185_v26  ;;  %v1437_v30 = vsub.f32 %v3145_v29, %v1436_v51  ;;  %v1424_v4 = vand.u32 4294901760, %v1423_v39 }
 0x13b   :  { %v1402_v63 = vsub.f32 %v3117_v2, %v1401_v50  ;;  %2324 = vmatpush3.msra.mxu0 %v3070_v56  ;;  %v1396_v53 = vand.u32 4294901760, %v1395_v54  ;;  %v1277_v54 = vmax.f32 %v3193_v52, 0.0  ;;  %v3224_v37 = vand.u32 4294901760, %v1279_v8 }
 0x13c   :  { %2325 = vmatprep.subr.mxu0 %v3489_v49  ;;  %v3229_v9 = vsub.f32 %v1293_v46, %v3200_v20  ;;  %v3232_v7 = vsub.f32 %v1281_v11, %v3196_v32  ;;  %v1457_v24 = vand.u32 4294901760, %v3203_v28  ;;  %v3239_v3 = vand.u32 4294901760, %v1278_v16 }
 0x13d   :  { %2326 = vmatpush3.msra.mxu0 %v3077_v31  ;;  %2353 = vmatpush3.msra.mxu1 %v1396_v53  ;;  %v1403_v48 = vand.u32 4294901760, %v1402_v63  ;;  %v1444_v63 = vsub.f32 %v3166_v18, %v1443_v61  ;;  %v1431_v53 = vand.u32 4294901760, %v1430_v57  ;;  %v3244_v21 = vsub.f32 %v1280_v10, %v3211_v5 }
 0x13e   :  { %2327 = vmatprep.subr.mxu0 %v3489_v49  ;;  %2354 = vmatprep.subr.mxu1 %v3489_v49  ;;  %v1464_v38 = vand.u32 4294901760, %v3216_v23  ;;  %v1451_v25 = vsub.f32 %v3185_v26, %v1450_v42  ;;  %v1438_v34 = vand.u32 4294901760, %v1437_v30  ;;  %v3251_v11 = vand.u32 4294901760, %v1277_v54 }
 0x13f   :  { %2328 = vmatpush3.msra.mxu0 %v3091_v27  ;;  %2355 = vmatpush3.msra.mxu1 %v1403_v48  ;;  %v1383_v60 = vand.u32 4294901760, %v3229_v9  ;;  %v3257_v48 = vsub.f32 %v1279_v8, %v3224_v37  ;;  %v1471_v46 = vand.u32 4294901760, %v3232_v7  ;;  %v1458_v40 = vsub.f32 %v3203_v28, %v1457_v24 }
 0x140   :  { %2329 = vmatprep.subr.mxu0 %v3489_v49  ;;  %2356 = vmatprep.subr.mxu1 %v3489_v49  ;;  %v1445_v55 = vand.u32 4294901760, %v1444_v63  ;;  %v3267_v10 = vsub.f32 %v1278_v16, %v3239_v3  ;;  %v1478_v39 = vand.u32 4294901760, %v3244_v21  ;;  %v1452_v22 = vand.u32 4294901760, %v1451_v25 }
 0x141   :  { %2330 = vmatpush3.msra.mxu0 %v3108_v47  ;;  %2357 = vmatpush3.msra.mxu1 %v1410_v12  ;;  %v1465_v12 = vsub.f32 %v3216_v23, %v1464_v38  ;;  %v1384_v52 = vsub.f32 %v3229_v9, %v1383_v60  ;;  %v3280_v8 = vsub.f32 %v1277_v54, %v3251_v11  ;;  %v1485_v57 = vand.u32 4294901760, %v3257_v48 }
 0x142   :  { %2331 = vmatprep.subr.mxu0 %v3489_v49  ;;  %2358 = vmatprep.subr.mxu1 %v3489_v49  ;;  %v1459_v16 = vand.u32 4294901760, %v1458_v40  ;;  %v1492_v30 = vand.u32 4294901760, %v3267_v10 }
 0x143   :  { %2332 = vmatpush3.msra.mxu0 %v3126_v41  ;;  %2359 = vmatpush3.msra.mxu1 %v1417_v45  ;;  %v1472_v45 = vsub.f32 %v3232_v7, %v1471_v46  ;;  %v1466_v54 = vand.u32 4294901760, %v1465_v12  ;;  %v1385_v63 = vand.u32 4294901760, %v1384_v52  ;;  %v1486_v25 = vsub.f32 %v3257_v48, %v1485_v57 }
 0x144   :  { %2333 = vmatprep.subr.mxu0 %v3489_v49  ;;  %2360 = vmatprep.subr.mxu1 %v3489_v49  ;;  %v1493_v40 = vsub.f32 %v3267_v10, %v1492_v30 }
 0x145   :  { %2334 = vmatpush3.msra.mxu0 %v3142_v15  ;;  %2361 = vmatpush3.msra.mxu1 %v1424_v4  ;;  %v1479_v4 = vsub.f32 %v3244_v21, %v1478_v39 }
 0x146   :  { %2335 = vmatprep.subr.mxu0 %v3489_v49  ;;  %2362 = vmatprep.subr.mxu1 %v3489_v49  ;;  %v1494_v52 = vand.u32 4294901760, %v1493_v40 }
 0x147   :  { %2336 = vmatpush3.msra.mxu0 %v3162_v59  ;;  %2363 = vmatpush3.msra.mxu1 %v1431_v53  ;;  %v1499_v53 = vand.u32 4294901760, %v3280_v8 }
 0x148   :  { %2337 = vmatprep.subr.mxu0 %v3489_v49  ;;  %2364 = vmatprep.subr.mxu1 %v3489_v49 }
 0x149   :  { %2338 = vmatpush3.msra.mxu0 %v3180_v44  ;;  %2365 = vmatpush3.msra.mxu1 %v1438_v34  ;;  %v1473_v34 = vand.u32 4294901760, %v1472_v45  ;;  %v1500_v12 = vsub.f32 %v3280_v8, %v1499_v53 }
 0x14a   :  { %2339 = vmatprep.subr.mxu0 %v3489_v49  ;;  %2366 = vmatprep.subr.mxu1 %v3489_v49 }
 0x14b   :  { %2340 = vmatpush3.msra.mxu0 %v3196_v32  ;;  %2367 = vmatpush3.msra.mxu1 %v1445_v55  ;;  %v1480_v55 = vand.u32 4294901760, %v1479_v4  ;;  %v1501_v45 = vand.u32 4294901760, %v1500_v12 }
 0x14c   :  { %2341 = vmatprep.subr.mxu0 %v3489_v49  ;;  %2368 = vmatprep.subr.mxu1 %v3489_v49 }
 0x14d   :  { %2342 = vmatpush3.msra.mxu0 %v3211_v5  ;;  %2369 = vmatpush3.msra.mxu1 %v1452_v22  ;;  %v1487_v22 = vand.u32 4294901760, %v1486_v25 }
 0x14e   :  { %2343 = vmatprep.subr.mxu0 %v3489_v49  ;;  %2370 = vmatprep.subr.mxu1 %v3489_v49 }
 0x14f   :  { %2344 = vmatpush3.msra.mxu0 %v3224_v37  ;;  %2371 = vmatpush3.msra.mxu1 %v1459_v16 }
 0x150   :  { %2345 = vmatprep.subr.mxu0 %v3489_v49  ;;  %2372 = vmatprep.subr.mxu1 %v3489_v49 }
 0x151   :  { %2346 = vmatpush3.msra.mxu0 %v3239_v3  ;;  %2373 = vmatpush3.msra.mxu1 %v1466_v54 }
 0x152   :  { %2347 = vmatprep.subr.mxu0 %v3489_v49  ;;  %2374 = vmatprep.subr.mxu1 %v3489_v49 }
 0x153   :  { %2348 = vmatpush3.msra.mxu0 %v3251_v11  ;;  %2375 = vmatpush3.msra.mxu1 %v1473_v34 }
 0x154   :  { %2350 = vmatmul.mubr.f32.vlgmr.msra.gmra.mxu0 %v1385_v63  ;;  %2376 = vmatprep.subr.mxu1 %v3489_v49 }
 0x155   :  { %2387 = vmatprep.subr.mxu0 %v3489_v49  ;;  %2377 = vmatpush3.msra.mxu1 %v1480_v55 }
 0x156   :  { %2388 = vmatpush3.msra.mxu0 %v3097_v43  ;;  %2378 = vmatprep.subr.mxu1 %v3489_v49 }
 0x157   :  { %2389 = vmatprep.subr.mxu0 %v3489_v49  ;;  %2379 = vmatpush3.msra.mxu1 %v1487_v22 }
 0x158   :  { %2390 = vmatpush3.msra.mxu0 %v3117_v2  ;;  %2380 = vmatprep.subr.mxu1 %v3489_v49 }
 0x159   :  { %2391 = vmatprep.subr.mxu0 %v3489_v49  ;;  %2381 = vmatpush3.msra.mxu1 %v1494_v52 }
 0x15a   :  { %2392 = vmatpush3.msra.mxu0 %v3080_v62  ;;  %2382 = vmatprep.subr.mxu1 %v3489_v49 }
 0x15b   :  { %2393 = vmatprep.subr.mxu0 %v3489_v49  ;;  %2383 = vmatpush3.msra.mxu1 %v1501_v45 }
 0x15c   :  { %2394 = vmatpush3.msra.mxu0 %v3094_v36  ;;  %2385 = vmatmul.mubr.f32.vlgmr.msra.gmra.mxu1 %v3200_v20 }
 0x15d   :  { %2395 = vmatprep.subr.mxu0 %v3489_v49  ;;  %2422 = vmatprep.subr.mxu1 %v3489_v49 }
 0x15e   :  { %2396 = vmatpush3.msra.mxu0 %v3112_v13  ;;  %2423 = vmatpush3.msra.mxu1 %v3082_v19 }
 0x15f   :  { %2397 = vmatprep.subr.mxu0 %v3489_v49  ;;  %2424 = vmatprep.subr.mxu1 %v3489_v49 }
 0x160   :  { %2398 = vmatpush3.msra.mxu0 %v3130_v58  ;;  %2425 = vmatpush3.msra.mxu1 %v3099_v1 }
 0x161   :  { %2399 = vmatprep.subr.mxu0 %v3489_v49  ;;  %2426 = vmatprep.subr.mxu1 %v3489_v49 }
 0x162   :  { %2400 = vmatpush3.msra.mxu0 %v3145_v29  ;;  %2427 = vmatpush3.msra.mxu1 %v3068_v17 }
 0x163   :  { %2401 = vmatprep.subr.mxu0 %v3489_v49  ;;  %2428 = vmatprep.subr.mxu1 %v3489_v49 }
 0x164   :  { %2402 = vmatpush3.msra.mxu0 %v3166_v18  ;;  %2429 = vmatpush3.msra.mxu1 %v3070_v56 }
 0x165   :  { %2403 = vmatprep.subr.mxu0 %v3489_v49  ;;  %2430 = vmatprep.subr.mxu1 %v3489_v49 }
 0x166   :  { %2404 = vmatpush3.msra.mxu0 %v3185_v26  ;;  %2431 = vmatpush3.msra.mxu1 %v3077_v31 }
 0x167   :  { %2405 = vmatprep.subr.mxu0 %v3489_v49  ;;  %2432 = vmatprep.subr.mxu1 %v3489_v49 }
 0x168   :  { %2406 = vmatpush3.msra.mxu0 %v3203_v28  ;;  %2433 = vmatpush3.msra.mxu1 %v3091_v27 }
 0x169   :  { %2407 = vmatprep.subr.mxu0 %v3489_v49  ;;  %2434 = vmatprep.subr.mxu1 %v3489_v49 }
 0x16a   :  { %2408 = vmatpush3.msra.mxu0 %v3216_v23  ;;  %2435 = vmatpush3.msra.mxu1 %v3108_v47 }
 0x16b   :  { %2409 = vmatprep.subr.mxu0 %v3489_v49  ;;  %2436 = vmatprep.subr.mxu1 %v3489_v49 }
 0x16c   :  { %2410 = vmatpush3.msra.mxu0 %v3232_v7  ;;  %2437 = vmatpush3.msra.mxu1 %v3126_v41 }
 0x16d   :  { %2411 = vmatprep.subr.mxu0 %v3489_v49  ;;  %2438 = vmatprep.subr.mxu1 %v3489_v49 }
 0x16e   :  { %2412 = vmatpush3.msra.mxu0 %v3244_v21  ;;  %2439 = vmatpush3.msra.mxu1 %v3142_v15 }
 0x16f   :  { %2413 = vmatprep.subr.mxu0 %v3489_v49  ;;  %2440 = vmatprep.subr.mxu1 %v3489_v49 }
 0x170   :  { %2414 = vmatpush3.msra.mxu0 %v3257_v48  ;;  %2441 = vmatpush3.msra.mxu1 %v3162_v59 }
 0x171   :  { %2415 = vmatprep.subr.mxu0 %v3489_v49  ;;  %2442 = vmatprep.subr.mxu1 %v3489_v49 }
 0x172   :  { %2416 = vmatpush3.msra.mxu0 %v3267_v10  ;;  %2443 = vmatpush3.msra.mxu1 %v3180_v44 }
 0x173   :  { %2417 = vmatprep.subr.mxu0 %v3489_v49  ;;  %2444 = vmatprep.subr.mxu1 %v3489_v49 }
 0x174   :  { %2418 = vmatpush3.msra.mxu0 %v3280_v8  ;;  %2419 = vmatprep.mubr.msk.f32.mxu0 %vm2557_vm1, %v3489_v49 }
 0x175   :  { %2445 = vmatpush3.msra.mxu1 %v3196_v32  ;;  %2420 = vmatmul.mubr.f32.vlgmr.msra.gmra.mxu0 %v3229_v9 }
 0x176   :  { %2446 = vmatprep.subr.mxu1 %v3489_v49  ;;  %2457 = vmatprep.subr.mxu0 %v3489_v49 }
 0x177   :  { %2447 = vmatpush3.msra.mxu1 %v3211_v5  ;;  %2458 = vmatpush3.msra.mxu0 %v1394_v0 }
 0x178   :  { %2448 = vmatprep.subr.mxu1 %v3489_v49  ;;  %2459 = vmatprep.subr.mxu0 %v3489_v49 }
 0x179   :  { %2449 = vmatpush3.msra.mxu1 %v3224_v37  ;;  %2460 = vmatpush3.msra.mxu0 %v1401_v50 }
 0x17a   :  { %2450 = vmatprep.subr.mxu1 %v3489_v49  ;;  %2461 = vmatprep.subr.mxu0 %v3489_v49 }
 0x17b   :  { %2451 = vmatpush3.msra.mxu1 %v3239_v3  ;;  %2462 = vmatpush3.msra.mxu0 %v1408_v35 }
 0x17c   :  { %2452 = vmatprep.subr.mxu1 %v3489_v49  ;;  %2463 = vmatprep.subr.mxu0 %v3489_v49 }
 0x17d   :  { %2453 = vmatpush3.msra.mxu1 %v3251_v11  ;;  %2454 = vmatprep.mubr.msk.f32.mxu1 %vm2557_vm1, %v3489_v49 }
 0x17e   :  { %2464 = vmatpush3.msra.mxu0 %v1415_v14  ;;  %2455 = vmatmul.mubr.f32.vlgmr.msra.gmra.mxu1 %v1383_v60 }
 0x17f   :  { %2465 = vmatprep.subr.mxu0 %v3489_v49  ;;  %2492 = vmatprep.subr.mxu1 %v3489_v49 }
 0x180   :  { %2466 = vmatpush3.msra.mxu0 %v1422_v33  ;;  %2493 = vmatpush3.msra.mxu1 %v3082_v19 }
 0x181   :  { %2467 = vmatprep.subr.mxu0 %v3489_v49  ;;  %2494 = vmatprep.subr.mxu1 %v3489_v49 }
 0x182   :  { %2468 = vmatpush3.msra.mxu0 %v1429_v6  ;;  %2495 = vmatpush3.msra.mxu1 %v3099_v1  ;;  %v1298_v1 = vpop.permute.xlu0 %1297 }
 0x183   :  { %2469 = vmatprep.subr.mxu0 %v3489_v49  ;;  %2496 = vmatprep.subr.mxu1 %v3489_v49 }
 0x184   :  { %2470 = vmatpush3.msra.mxu0 %v1436_v51  ;;  %2497 = vmatpush3.msra.mxu1 %v3068_v17 }
 0x185   :  { %2471 = vmatprep.subr.mxu0 %v3489_v49  ;;  %2498 = vmatprep.subr.mxu1 %v3489_v49 }
 0x186   :  { %2472 = vmatpush3.msra.mxu0 %v1443_v61  ;;  %2499 = vmatpush3.msra.mxu1 %v3070_v56 }
 0x187   :  { %2473 = vmatprep.subr.mxu0 %v3489_v49  ;;  %2500 = vmatprep.subr.mxu1 %v3489_v49 }
 0x188   :  { %2474 = vmatpush3.msra.mxu0 %v1450_v42  ;;  %2501 = vmatpush3.msra.mxu1 %v3077_v31 }
 0x189   :  { %2475 = vmatprep.subr.mxu0 %v3489_v49  ;;  %2502 = vmatprep.subr.mxu1 %v3489_v49 }
 0x18a   :  { %2476 = vmatpush3.msra.mxu0 %v1457_v24  ;;  %2503 = vmatpush3.msra.mxu1 %v3091_v27 }
 0x18b   :  { %2477 = vmatprep.subr.mxu0 %v3489_v49  ;;  %2504 = vmatprep.subr.mxu1 %v3489_v49 }
 0x18c   :  { %2478 = vmatpush3.msra.mxu0 %v1464_v38  ;;  %2505 = vmatpush3.msra.mxu1 %v3108_v47 }
 0x18d   :  { %2479 = vmatprep.subr.mxu0 %v3489_v49  ;;  %2506 = vmatprep.subr.mxu1 %v3489_v49 }
 0x18e   :  { %2480 = vmatpush3.msra.mxu0 %v1471_v46  ;;  %2507 = vmatpush3.msra.mxu1 %v3126_v41 }
 0x18f   :  { %2481 = vmatprep.subr.mxu0 %v3489_v49  ;;  %2508 = vmatprep.subr.mxu1 %v3489_v49 }
 0x190   :  { %2482 = vmatpush3.msra.mxu0 %v1478_v39  ;;  %2509 = vmatpush3.msra.mxu1 %v3142_v15 }
 0x191   :  { %2483 = vmatprep.subr.mxu0 %v3489_v49  ;;  %2510 = vmatprep.subr.mxu1 %v3489_v49 }
 0x192   :  { %2484 = vmatpush3.msra.mxu0 %v1485_v57  ;;  %2511 = vmatpush3.msra.mxu1 %v3162_v59 }
 0x193   :  { %2485 = vmatprep.subr.mxu0 %v3489_v49  ;;  %2512 = vmatprep.subr.mxu1 %v3489_v49 }
 0x194   :  { %2486 = vmatpush3.msra.mxu0 %v1492_v30  ;;  %2513 = vmatpush3.msra.mxu1 %v3180_v44 }
 0x195   :  { %2487 = vmatprep.subr.mxu0 %v3489_v49  ;;  %2514 = vmatprep.subr.mxu1 %v3489_v49 }
 0x196   :  { %2488 = vmatpush3.msra.mxu0 %v1499_v53  ;;  %2489 = vmatprep.mubr.msk.f32.mxu0 %vm2557_vm1, %v3489_v49 }
 0x197   :  { %2515 = vmatpush3.msra.mxu1 %v3196_v32  ;;  %2490 = vmatmul.mubr.f32.vlgmr.msra.gmra.mxu0 %v3200_v20 }
 0x198   :  { %2516 = vmatprep.subr.mxu1 %v3489_v49  ;;  %2524 = vmatprep.mubr.msk.f32.mxu1 %vm2557_vm1, %v3489_v49 }
 0x199   :  { %2517 = vmatpush3.msra.mxu1 %v3211_v5 }
 0x19a   :  { %2518 = vmatprep.subr.mxu1 %v3489_v49 }
 0x19b   :  { %2519 = vmatpush3.msra.mxu1 %v3224_v37 }
 0x19c   :  { %2520 = vmatprep.subr.mxu1 %v3489_v49 }
 0x19d   :  { %2521 = vmatpush3.msra.mxu1 %v3239_v3 }
 0x19e   :  { %2522 = vmatprep.subr.mxu1 %v3489_v49 }
 0x19f   :  { %2523 = vmatpush3.msra.mxu1 %v3251_v11 }
 0x1a0   :  { %2525 = vmatmul.mubr.f32.vlgmr.msra.gmra.mxu1 %v3200_v20 }
 0x214   :  { %v1387_v17 = vpop.f32.mrf.mxu0 }
 0x215   :  { %v1388_v47 = vadd.f32 %v1387_v17, %v1298_v1 }
 0x216   :  { %v2351_v56 = vpop.f32.mrf.mxu0 }
 0x21c   :  { %v1538_v31 = vpop.f32.mrf.mxu1 }
 0x21d   :  { %v1539_v35 = vadd.f32 %v1538_v31, %v1388_v47 }
 0x21e   :  { %v2386_v62 = vpop.f32.mrf.mxu1 }
 0x235   :  { %v1642_v19 = vpop.f32.mrf.mxu0 }
 0x236   :  { %v1643_v2 = vadd.f32 %v1642_v19, %v1539_v35 }
 0x237   :  { %v2421_v27 = vpop.f32.mrf.mxu0 }
 0x23e   :  { %v1731_v36 = vpop.f32.mrf.mxu1 }
 0x23f   :  { %v1732_v41 = vadd.f32 %v1731_v36, %v1643_v2 }
 0x240   :  { %v2456_v43 = vpop.f32.mrf.mxu1 }
 0x257   :  { %v1850_v13 = vpop.f32.mrf.mxu0 }
 0x258   :  { %v1851_v49 = vadd.f32 %v1850_v13, %v1732_v41 }
 0x259   :  { %v2491_v0 = vpop.f32.mrf.mxu0 }
 0x260   :  { %v1937_v58 = vpop.f32.mrf.mxu1 }
 0x261   :  { %v1938_v14 = vadd.f32 %v1937_v58, %v1851_v49 }
 0x262   :  { %v2526_v50 = vpop.f32.mrf.mxu1 }
 0x263   :  { %1942 = vst.msk [vmem:[#allocation2] sm:$0x3] %vm1941_vm2, %v1938_v14 }
 0x264   :  { %2544 = shalt.err (!%p2541_p4)
}
 0x265   :  { %1952 = dma.vmem_to_hbm [thread:$0]  %s1950_s7, 32, %s3480_s5, [#allocation3]  }
 0x266   :  { %2553 = dma.done.wait [#allocation3], 32  }
 0x267   :  { %2554 = vsyncadd [#allocation3], 4294967264 }
 0x268   :  { %1956 = vsyncpa [#allocation3], 1 }

</bundles_post_ra>
